<compile_context>
chip_gen: v7x
topology: tpu7x:2x2x1
jax: 0.10.0
libtpu: 0.0.40
codegen_flags: <defaults>
</compile_context>

<pallas_src>
import functools

import jax
import jax.numpy as jnp
from jax.experimental import pallas as pl
from jax.experimental.pallas import tpu as pltpu


def _view_dma_kernel(x_hbm_ref, o_hbm_ref, copy_sem):
    # One whole-tensor HBM -> HBM DMA: no VMEM staging, no grid loop.
    copy = pltpu.make_async_copy(x_hbm_ref, o_hbm_ref, copy_sem)
    copy.start()
    copy.wait()


@functools.partial(jax.jit, static_argnames=("size",))
def pallas_view(x, size):
    """Equivalent of `torch.Tensor.view(size)` with a Pallas DMA data path."""
    copied = pl.pallas_call(
        _view_dma_kernel,
        out_shape=jax.ShapeDtypeStruct(x.shape, x.dtype),
        in_specs=[pl.BlockSpec(memory_space=pl.ANY)],   # raw HBM ref, no auto-DMA
        out_specs=pl.BlockSpec(memory_space=pl.ANY),    # raw HBM ref, no auto-DMA
        scratch_shapes=[pltpu.SemaphoreType.DMA],       # completion semaphore
    )(x)
    # The `view` itself: metadata-only reshape (same row-major element order
    # as torch .view on a contiguous tensor).
    return copied.reshape(size)


class View:
    """Pallas-backed equivalent of the PyTorch `View` nn.Module."""

    def __init__(self, size):
        self.size = tuple(size)

    def __call__(self, tensor):
        return pallas_view(tensor, self.size)


if __name__ == "__main__":
    key = jax.random.PRNGKey(0)
    # NCHW-style input, as a Sequential would feed into View before a Linear.
    x = jax.random.normal(key, (2, 4, 16, 16), dtype=jnp.float32)

    # View((B, C*H*W)): flatten per batch element.
    target_size = (2, 4 * 16 * 16)
    view = View(target_size)
    y = jax.block_until_ready(view(x))

    ref = x.reshape(target_size)
    assert y.shape == target_size, (y.shape, target_size)
    assert y.dtype == x.dtype
    assert jnp.array_equal(y, ref), "Pallas View output mismatch"

    # View((-1, H*W)): -1 size inference, same data path.
    view2 = View((-1, 16 * 16))
    y2 = jax.block_until_ready(view2(x))
    assert y2.shape == (8, 256), y2.shape
    assert jnp.array_equal(y2, x.reshape(-1, 16 * 16)), "Pallas View -1 mismatch"

    print("KERNEL_OK")
</pallas_src>

<mosaic_0001>
module attributes {stable_mosaic.version = 11 : i64} {
  func.func @_view_dma_kernel(%arg0: memref<2x4x16x16xf32, #tpu.memory_space<any>>, %arg1: memref<2x4x16x16xf32, #tpu.memory_space<any>>, %arg2: memref<!tpu.dma_semaphore, #tpu.memory_space<semaphore_mem>>) attributes {dimension_semantics = [], scalar_prefetch = 0 : i64, scratch_operands = 1 : i64, tpu.core_type = #tpu.core_type<tc>} {
    tpu.enqueue_dma source(%arg0 : memref<2x4x16x16xf32, #tpu.memory_space<any>>) target(%arg1 : memref<2x4x16x16xf32, #tpu.memory_space<any>>) target_semaphore(%arg2 : memref<!tpu.dma_semaphore, #tpu.memory_space<semaphore_mem>>)
    tpu.wait_dma2 semaphore(%arg2 : memref<!tpu.dma_semaphore, #tpu.memory_space<semaphore_mem>>) src(%arg0 : memref<2x4x16x16xf32, #tpu.memory_space<any>>) dst(%arg1 : memref<2x4x16x16xf32, #tpu.memory_space<any>>)
    return
  }
}

</mosaic_0001>

<bundles_post_ra>
// kernel: pallas_view.1
= control target key start
LH: loop header
LB: loop body
LE: loop exit
PB: predicated region body
PF: predicated region fallthrough
CT: control target
= control target key end

     0   :  { %s78_s0 = inlined_call_operand.hbm [shape: f32[2,4,16,16], index: 0, kind: input, shape index: {}]   ;;  %s79_s1 = inlined_call_operand.vmem [shape: f32[2,4,16,16], index: 1, kind: output, shape index: {}]  }
   0x1   :  { %s13_s8 = sshll.u32 %s79_s1, 4  ;;  %s29_s11 = scalar_lea.hbm %s78_s0, 2048  ;;  %s14_s8 = int_to_ptr.vmem [resolvable:$true] %s13_s8 }
   0x2   :  { %p30_p0 = scmp.ne.s32.totalorder %s78_s0, %s29_s11  ;;  %p33_p1 = scmp.lt.u32.totalorder %s29_s11, %s78_s0 }
   0x4   :  { %p35_p2 = pnand %p33_p1, %p30_p0 }
   0x6   :  { %38 = shalt.err (!%p35_p2)  }
   0x7   :  { %s39_s16 = scalar_lea.vmem %s14_s8, 2048  ;;  %p44_p4 = scmp.lt.s32.totalorder %s14_s8, %s14_s8 }
   0x8   :  { %p40_p3 = scmp.ne.s32.totalorder %s14_s8, %s39_s16  ;;  %p45_p5 = scmp.lt.s32.totalorder %s39_s16, %s39_s16 }
   0xa   :  { %p46_p6 = por %p45_p5, %p44_p4 }
   0xc   :  { %p47_p7 = pnand %p46_p6, %p40_p3 }
   0xe   :  { %50 = shalt.err (!%p47_p7)  }
   0xf   :  { %16 = dma.hbm_to_vmem [thread:$0]  %s78_s0, 2048, %s14_s8, [#allocation2] }
  0x10   :  { %51 = dma.done.wait [#allocation2], 2048 }
  0x11   :  { %52 = vsyncadd [#allocation2], 4294965248 }
  0x12   :  { %22 = vsyncmov [#allocation2] }
  0x15   :  { %s23_s18 = vpop.sfrf %22 }
  0x16   :  { %p28_p8 = scmp.ne.s32.totalorder %s23_s18, 0 }
  0x18   :  { %27 = shalt.err (%p28_p8)  }

</bundles_post_ra>
